<compile_context>
chip_gen: v7x
topology: tpu7x:2x2x1
jax: 0.10.0
libtpu: 0.0.40
codegen_flags: <defaults>
</compile_context>

<pallas_src>
import functools

import jax
import jax.numpy as jnp
from jax.experimental import pallas as pl
from jax.experimental.pallas import tpu as pltpu

TAU = 0.5  # gumbel-softmax temperature used by the module


def _align8(n):
    return ((n + 7) // 8) * 8


def _disc_comm_kernel(H, M, enc_offs, gru_offs,
                      xh_ref, gn_ref, s_ref, d_ref, enc_ref, gru_ref, out_ref):
    f32 = jnp.float32
    M2 = 2 * M
    H2 = 2 * H
    o_wenc, o_wdec, o_benc, o_bdec = enc_offs
    o_wix, o_wid, o_wh, o_bi, o_bh = gru_offs

    xh = xh_ref[...]                   # (N, 2H) = cat(x, h)
    x = xh[:, :H]
    h = xh[:, H:]

    # ---- f_enc: single fused dot, logits = cat(x, h) @ W_enc^T + b_enc
    logits = (jnp.dot(xh, enc_ref[o_wenc:o_wenc + H2, :], preferred_element_type=f32)
              + enc_ref[o_benc:o_benc + 1, :])                          # (N, 2M)

    # ---- gather src-node logits per edge: (E, N) @ (N, 2M)
    edge_logits = jnp.dot(s_ref[...], logits, preferred_element_type=f32)
    y = (edge_logits + gn_ref[...]) / TAU                                # (E, 2M)

    # ---- hard gumbel-softmax over consecutive (even, odd) lane pairs.
    # One even<->odd swap permutation matmul + VPU compares; tie-break matches
    # argmax-first-index (>= on the even lane, strict > on the odd lane).
    ri = jax.lax.broadcasted_iota(jnp.int32, (M2, M2), 0)
    ci = jax.lax.broadcasted_iota(jnp.int32, (M2, M2), 1)
    p_swap = ((ri ^ 1) == ci).astype(f32)                                # (2M, 2M)
    y_swap = jnp.dot(y, p_swap, preferred_element_type=f32)              # y with pairs swapped
    lane = jax.lax.broadcasted_iota(jnp.int32, y.shape, 1)
    even = (lane & 1) == 0
    msg = jnp.where(even,
                    (y >= y_swap).astype(f32),
                    (y > y_swap).astype(f32))                            # (E, 2M) in {0,1}

    # ---- aggregate incoming discrete messages with element-wise OR:
    # clip((N,E)@(E,2M), 1); bf16 operands are exact on {0,1} (MXU-native on v6e/v7x).
    c = jnp.minimum(
        jnp.dot(d_ref[...], msg.astype(jnp.bfloat16), preferred_element_type=f32),
        1.0)                                                             # (N, 2M)

    # ---- f_dec
    dec = (jnp.dot(c, enc_ref[o_wdec:o_wdec + M2, :], preferred_element_type=f32)
           + enc_ref[o_bdec:o_bdec + 1, :])                              # (N, 2M)

    # ---- fused GRUCell(cat(x, dec), h): 3 dots, gate order r, z, n
    gi = (jnp.dot(x, gru_ref[o_wix:o_wix + H, :], preferred_element_type=f32)
          + jnp.dot(dec, gru_ref[o_wid:o_wid + M2, :], preferred_element_type=f32)
          + gru_ref[o_bi:o_bi + 1, :])                                   # (N, 3H)
    gh = (jnp.dot(h, gru_ref[o_wh:o_wh + H, :], preferred_element_type=f32)
          + gru_ref[o_bh:o_bh + 1, :])                                   # (N, 3H)

    r = jax.nn.sigmoid(gi[:, :H] + gh[:, :H])
    z = jax.nn.sigmoid(gi[:, H:H2] + gh[:, H:H2])
    n = jnp.tanh(gi[:, H2:] + r * gh[:, H2:])
    out_ref[...] = (1.0 - z) * n + z * h


def _pack_enc_slab(W_enc, b_enc, W_dec, b_dec, H, M):
    """Pack encoder/decoder weights + biases into one (rows, 2M) f32 slab."""
    M2 = 2 * M
    o_wenc = 0
    o_wdec = _align8(2 * H)
    o_benc = _align8(o_wdec + M2)
    o_bdec = o_benc + 8
    rows = o_bdec + 8
    slab = jnp.zeros((rows, M2), jnp.float32)
    slab = slab.at[o_wenc:o_wenc + 2 * H].set(W_enc.T)
    slab = slab.at[o_wdec:o_wdec + M2].set(W_dec.T)
    slab = slab.at[o_benc].set(b_enc)
    slab = slab.at[o_bdec].set(b_dec)
    return slab, (o_wenc, o_wdec, o_benc, o_bdec)


def _pack_gru_slab(W_ih, b_ih, W_hh, b_hh, H, M):
    """Pack GRUCell weights + biases into one (rows, 3H) f32 slab."""
    M2 = 2 * M
    Wi_T = W_ih.T       # (H + 2M, 3H)
    Wh_T = W_hh.T       # (H, 3H)
    o_wix = 0
    o_wid = _align8(H)
    o_wh = _align8(o_wid + M2)
    o_bi = _align8(o_wh + H)
    o_bh = o_bi + 8
    rows = o_bh + 8
    slab = jnp.zeros((rows, 3 * H), jnp.float32)
    slab = slab.at[o_wix:o_wix + H].set(Wi_T[:H])
    slab = slab.at[o_wid:o_wid + M2].set(Wi_T[H:])
    slab = slab.at[o_wh:o_wh + H].set(Wh_T)
    slab = slab.at[o_bi].set(b_ih)
    slab = slab.at[o_bh].set(b_hh)
    return slab, (o_wix, o_wid, o_wh, o_bi, o_bh)


def discrete_communication_forward(x, h, gnoise, S, D,
                                   W_enc, b_enc, W_dec, b_dec,
                                   W_ih, b_ih, W_hh, b_hh, msg_size):
    """Runs the Pallas kernel.  Returns (h_new, h_new) like the PyTorch module."""
    N, H = x.shape

    xh = jnp.concatenate([x.astype(jnp.float32), h.astype(jnp.float32)], axis=1)
    enc_slab, enc_offs = _pack_enc_slab(W_enc, b_enc, W_dec, b_dec, H, msg_size)
    gru_slab, gru_offs = _pack_gru_slab(W_ih, b_ih, W_hh, b_hh, H, msg_size)
    d_bf16 = D.astype(jnp.bfloat16)    # exact: one-hot {0,1}

    kernel = functools.partial(_disc_comm_kernel, H, msg_size, enc_offs, gru_offs)
    vmem = pl.BlockSpec(memory_space=pltpu.MemorySpace.VMEM)

    h_new = pl.pallas_call(
        kernel,
        out_shape=jax.ShapeDtypeStruct((N, H), jnp.float32),
        in_specs=[vmem, vmem, vmem, vmem, vmem, vmem],
        out_specs=vmem,
    )(xh, gnoise.astype(jnp.float32), S.astype(jnp.float32), d_bf16,
      enc_slab, gru_slab)
    return h_new, h_new


# ---------------------------------------------------------------------------
# Pure-JAX reference (mirrors the PyTorch forward) used as a correctness check.
# ---------------------------------------------------------------------------
def ref_forward(x, h, gnoise, src, dst, W_enc, b_enc, W_dec, b_dec,
                W_ih, b_ih, W_hh, b_hh, msg_size):
    N, H = x.shape
    E = src.shape[0]
    M = msg_size
    xh = jnp.concatenate([x, h], axis=1)
    logits = xh @ W_enc.T + b_enc
    y = (logits[src] + gnoise) / TAU
    idx = jnp.argmax(y.reshape(E, M, 2), axis=-1)
    msg = jax.nn.one_hot(idx, 2, dtype=jnp.float32).reshape(E, 2 * M)
    c = jnp.zeros((N, 2 * M), jnp.float32).at[dst].max(msg)
    dec = c @ W_dec.T + b_dec
    u = jnp.concatenate([x, dec], axis=1)
    gi = u @ W_ih.T + b_ih
    gh = h @ W_hh.T + b_hh
    r = jax.nn.sigmoid(gi[:, :H] + gh[:, :H])
    z = jax.nn.sigmoid(gi[:, H:2 * H] + gh[:, H:2 * H])
    n = jnp.tanh(gi[:, 2 * H:] + r * gh[:, 2 * H:])
    return (1.0 - z) * n + z * h


if __name__ == "__main__":
    N, H, MSG = 8, 32, 8            # nodes, hidden_size, msg_size
    TWO_M = 2 * MSG

    # small graph: two out-edges per node
    src = jnp.array([i for i in range(N)] + [i for i in range(N)], dtype=jnp.int32)
    dst = jnp.array([(i + 1) % N for i in range(N)] + [(i + 3) % N for i in range(N)],
                    dtype=jnp.int32)
    E = src.shape[0]
    S = jax.nn.one_hot(src, N, dtype=jnp.float32)            # (E, N) src gather
    D = jax.nn.one_hot(dst, N, dtype=jnp.float32).T          # (N, E) dst scatter

    key = jax.random.PRNGKey(0)
    ks = jax.random.split(key, 11)

    def unif(k, shape, fan_in):
        b = 1.0 / jnp.sqrt(fan_in)
        return jax.random.uniform(k, shape, jnp.float32, -b, b)

    # parameters (PyTorch layouts), deterministic init
    W_enc = unif(ks[0], (TWO_M, 2 * H), 2 * H)
    b_enc = unif(ks[1], (TWO_M,), 2 * H)
    W_dec = unif(ks[2], (TWO_M, TWO_M), TWO_M)
    b_dec = unif(ks[3], (TWO_M,), TWO_M)
    W_ih = unif(ks[4], (3 * H, H + TWO_M), H)
    b_ih = unif(ks[5], (3 * H,), H)
    W_hh = unif(ks[6], (3 * H, H), H)
    b_hh = unif(ks[7], (3 * H,), H)

    x = jax.random.normal(ks[8], (N, H), jnp.float32)
    h = jax.random.normal(ks[9], (N, H), jnp.float32)
    gnoise = jax.random.gumbel(ks[10], (E, TWO_M), jnp.float32)

    h_new, h_new2 = discrete_communication_forward(
        x, h, gnoise, S, D, W_enc, b_enc, W_dec, b_dec,
        W_ih, b_ih, W_hh, b_hh, MSG)
    jax.block_until_ready(h_new)

    ref = ref_forward(x, h, gnoise, src, dst, W_enc, b_enc, W_dec, b_dec,
                      W_ih, b_ih, W_hh, b_hh, MSG)
    assert h_new.shape == (N, H)
    assert jnp.allclose(h_new, ref, atol=1e-3, rtol=1e-3), "kernel mismatch vs reference"
    print("KERNEL_OK")
</pallas_src>

<mosaic_0001>
module attributes {stable_mosaic.version = 11 : i64} {
  func.func @_disc_comm_kernel(%arg0: memref<8x64xf32, #tpu.memory_space<vmem>>, %arg1: memref<16x16xf32, #tpu.memory_space<vmem>>, %arg2: memref<16x8xf32, #tpu.memory_space<vmem>>, %arg3: memref<8x16xbf16, #tpu.memory_space<vmem>>, %arg4: memref<96x16xf32, #tpu.memory_space<vmem>>, %arg5: memref<96x96xf32, #tpu.memory_space<vmem>>, %arg6: memref<8x32xf32, #tpu.memory_space<vmem>>) attributes {dimension_semantics = [], scalar_prefetch = 0 : i64, scratch_operands = 0 : i64, tpu.core_type = #tpu.core_type<tc>} {
    %c0 = arith.constant 0 : index
    %c0_0 = arith.constant 0 : index
    %0 = vector.load %arg0[%c0, %c0_0] : memref<8x64xf32, #tpu.memory_space<vmem>>, vector<8x64xf32>
    %1 = vector.extract_strided_slice %0 {offsets = [0, 0], sizes = [8, 32], strides = [1, 1]} : vector<8x64xf32> to vector<8x32xf32>
    %2 = vector.extract_strided_slice %0 {offsets = [0, 32], sizes = [8, 32], strides = [1, 1]} : vector<8x64xf32> to vector<8x32xf32>
    %c0_1 = arith.constant 0 : index
    %c0_2 = arith.constant 0 : index
    %3 = vector.load %arg4[%c0_1, %c0_2] : memref<96x16xf32, #tpu.memory_space<vmem>>, vector<64x16xf32>
    %cst = arith.constant dense<0.000000e+00> : vector<8x16xf32>
    %4 = tpu.matmul %0, %3, %cst {dimension_numbers = #tpu.dot_dimension_numbers<[1], [0], [0], [1], [0, 0, 1, 1], [], []>} : vector<8x64xf32>, vector<64x16xf32>, vector<8x16xf32> -> vector<8x16xf32>
    %c80 = arith.constant 80 : index
    %c0_3 = arith.constant 0 : index
    %5 = vector.load %arg4[%c80, %c0_3] : memref<96x16xf32, #tpu.memory_space<vmem>>, vector<1x16xf32>
    %6 = vector.broadcast %5 : vector<1x16xf32> to vector<8x16xf32>
    %7 = arith.addf %4, %6 : vector<8x16xf32>
    %c0_4 = arith.constant 0 : index
    %c0_5 = arith.constant 0 : index
    %8 = vector.load %arg2[%c0_4, %c0_5] : memref<16x8xf32, #tpu.memory_space<vmem>>, vector<16x8xf32>
    %cst_6 = arith.constant dense<0.000000e+00> : vector<16x16xf32>
    %9 = tpu.matmul %8, %7, %cst_6 {dimension_numbers = #tpu.dot_dimension_numbers<[1], [0], [0], [1], [0, 0, 1, 1], [], []>} : vector<16x8xf32>, vector<8x16xf32>, vector<16x16xf32> -> vector<16x16xf32>
    %c0_7 = arith.constant 0 : index
    %c0_8 = arith.constant 0 : index
    %10 = vector.load %arg1[%c0_7, %c0_8] : memref<16x16xf32, #tpu.memory_space<vmem>>, vector<16x16xf32>
    %11 = arith.addf %9, %10 : vector<16x16xf32>
    %cst_9 = arith.constant 5.000000e-01 : f32
    %12 = vector.broadcast %cst_9 : f32 to vector<16x16xf32>
    %13 = arith.divf %11, %12 : vector<16x16xf32>
    %14 = tpu.iota {dimensions = array<i32: 0>} : vector<16x16xi32>
    %15 = tpu.iota {dimensions = array<i32: 1>} : vector<16x16xi32>
    %c1_i32 = arith.constant 1 : i32
    %16 = vector.broadcast %c1_i32 : i32 to vector<16x16xi32>
    %17 = arith.xori %14, %16 : vector<16x16xi32>
    %18 = arith.cmpi eq, %17, %15 : vector<16x16xi32>
    %19 = arith.extui %18 : vector<16x16xi1> to vector<16x16xi32>
    %20 = arith.sitofp %19 : vector<16x16xi32> to vector<16x16xf32>
    %cst_10 = arith.constant dense<0.000000e+00> : vector<16x16xf32>
    %21 = tpu.matmul %13, %20, %cst_10 {dimension_numbers = #tpu.dot_dimension_numbers<[1], [0], [0], [1], [0, 0, 1, 1], [], []>} : vector<16x16xf32>, vector<16x16xf32>, vector<16x16xf32> -> vector<16x16xf32>
    %22 = tpu.iota {dimensions = array<i32: 1>} : vector<16x16xi32>
    %c1_i32_11 = arith.constant 1 : i32
    %23 = vector.broadcast %c1_i32_11 : i32 to vector<16x16xi32>
    %24 = arith.andi %22, %23 : vector<16x16xi32>
    %c0_i32 = arith.constant 0 : i32
    %25 = vector.broadcast %c0_i32 : i32 to vector<16x16xi32>
    %26 = arith.cmpi eq, %24, %25 : vector<16x16xi32>
    %27 = arith.cmpf oge, %13, %21 : vector<16x16xf32>
    %28 = arith.extui %27 : vector<16x16xi1> to vector<16x16xi32>
    %29 = arith.sitofp %28 : vector<16x16xi32> to vector<16x16xf32>
    %30 = arith.cmpf ogt, %13, %21 : vector<16x16xf32>
    %31 = arith.extui %30 : vector<16x16xi1> to vector<16x16xi32>
    %32 = arith.sitofp %31 : vector<16x16xi32> to vector<16x16xf32>
    %33 = arith.select %26, %29, %32 : vector<16x16xi1>, vector<16x16xf32>
    %c0_12 = arith.constant 0 : index
    %c0_13 = arith.constant 0 : index
    %34 = vector.load %arg3[%c0_12, %c0_13] : memref<8x16xbf16, #tpu.memory_space<vmem>>, vector<8x16xbf16>
    %35 = arith.truncf %33 : vector<16x16xf32> to vector<16x16xbf16>
    %cst_14 = arith.constant dense<0.000000e+00> : vector<8x16xf32>
    %36 = tpu.matmul %34, %35, %cst_14 {dimension_numbers = #tpu.dot_dimension_numbers<[1], [0], [0], [1], [0, 0, 1, 1], [], []>} : vector<8x16xbf16>, vector<16x16xbf16>, vector<8x16xf32> -> vector<8x16xf32>
    %cst_15 = arith.constant 1.000000e+00 : f32
    %37 = vector.broadcast %cst_15 : f32 to vector<8x16xf32>
    %38 = arith.minimumf %36, %37 : vector<8x16xf32>
    %c64 = arith.constant 64 : index
    %c0_16 = arith.constant 0 : index
    %39 = vector.load %arg4[%c64, %c0_16] : memref<96x16xf32, #tpu.memory_space<vmem>>, vector<16x16xf32>
    %cst_17 = arith.constant dense<0.000000e+00> : vector<8x16xf32>
    %40 = tpu.matmul %38, %39, %cst_17 {dimension_numbers = #tpu.dot_dimension_numbers<[1], [0], [0], [1], [0, 0, 1, 1], [], []>} : vector<8x16xf32>, vector<16x16xf32>, vector<8x16xf32> -> vector<8x16xf32>
    %c88 = arith.constant 88 : index
    %c0_18 = arith.constant 0 : index
    %41 = vector.load %arg4[%c88, %c0_18] : memref<96x16xf32, #tpu.memory_space<vmem>>, vector<1x16xf32>
    %42 = vector.broadcast %41 : vector<1x16xf32> to vector<8x16xf32>
    %43 = arith.addf %40, %42 : vector<8x16xf32>
    %c0_19 = arith.constant 0 : index
    %c0_20 = arith.constant 0 : index
    %44 = vector.load %arg5[%c0_19, %c0_20] : memref<96x96xf32, #tpu.memory_space<vmem>>, vector<32x96xf32>
    %cst_21 = arith.constant dense<0.000000e+00> : vector<8x96xf32>
    %45 = tpu.matmul %1, %44, %cst_21 {dimension_numbers = #tpu.dot_dimension_numbers<[1], [0], [0], [1], [0, 0, 1, 1], [], []>} : vector<8x32xf32>, vector<32x96xf32>, vector<8x96xf32> -> vector<8x96xf32>
    %c32 = arith.constant 32 : index
    %c0_22 = arith.constant 0 : index
    %46 = vector.load %arg5[%c32, %c0_22] : memref<96x96xf32, #tpu.memory_space<vmem>>, vector<16x96xf32>
    %cst_23 = arith.constant dense<0.000000e+00> : vector<8x96xf32>
    %47 = tpu.matmul %43, %46, %cst_23 {dimension_numbers = #tpu.dot_dimension_numbers<[1], [0], [0], [1], [0, 0, 1, 1], [], []>} : vector<8x16xf32>, vector<16x96xf32>, vector<8x96xf32> -> vector<8x96xf32>
    %48 = arith.addf %45, %47 : vector<8x96xf32>
    %c80_24 = arith.constant 80 : index
    %c0_25 = arith.constant 0 : index
    %49 = vector.load %arg5[%c80_24, %c0_25] : memref<96x96xf32, #tpu.memory_space<vmem>>, vector<1x96xf32>
    %50 = vector.broadcast %49 : vector<1x96xf32> to vector<8x96xf32>
    %51 = arith.addf %48, %50 : vector<8x96xf32>
    %c48 = arith.constant 48 : index
    %c0_26 = arith.constant 0 : index
    %52 = vector.load %arg5[%c48, %c0_26] : memref<96x96xf32, #tpu.memory_space<vmem>>, vector<32x96xf32>
    %cst_27 = arith.constant dense<0.000000e+00> : vector<8x96xf32>
    %53 = tpu.matmul %2, %52, %cst_27 {dimension_numbers = #tpu.dot_dimension_numbers<[1], [0], [0], [1], [0, 0, 1, 1], [], []>} : vector<8x32xf32>, vector<32x96xf32>, vector<8x96xf32> -> vector<8x96xf32>
    %c88_28 = arith.constant 88 : index
    %c0_29 = arith.constant 0 : index
    %54 = vector.load %arg5[%c88_28, %c0_29] : memref<96x96xf32, #tpu.memory_space<vmem>>, vector<1x96xf32>
    %55 = vector.broadcast %54 : vector<1x96xf32> to vector<8x96xf32>
    %56 = arith.addf %53, %55 : vector<8x96xf32>
    %57 = vector.extract_strided_slice %51 {offsets = [0, 0], sizes = [8, 32], strides = [1, 1]} : vector<8x96xf32> to vector<8x32xf32>
    %58 = vector.extract_strided_slice %56 {offsets = [0, 0], sizes = [8, 32], strides = [1, 1]} : vector<8x96xf32> to vector<8x32xf32>
    %59 = arith.addf %57, %58 : vector<8x32xf32>
    %60 = arith.negf %59 : vector<8x32xf32>
    %61 = math.exp %60 : vector<8x32xf32>
    %cst_30 = arith.constant 1.000000e+00 : f32
    %62 = vector.broadcast %cst_30 : f32 to vector<8x32xf32>
    %63 = arith.addf %62, %61 : vector<8x32xf32>
    %64 = arith.divf %62, %63 : vector<8x32xf32>
    %65 = vector.extract_strided_slice %51 {offsets = [0, 32], sizes = [8, 32], strides = [1, 1]} : vector<8x96xf32> to vector<8x32xf32>
    %66 = vector.extract_strided_slice %56 {offsets = [0, 32], sizes = [8, 32], strides = [1, 1]} : vector<8x96xf32> to vector<8x32xf32>
    %67 = arith.addf %65, %66 : vector<8x32xf32>
    %68 = arith.negf %67 : vector<8x32xf32>
    %69 = math.exp %68 : vector<8x32xf32>
    %cst_31 = arith.constant 1.000000e+00 : f32
    %70 = vector.broadcast %cst_31 : f32 to vector<8x32xf32>
    %71 = arith.addf %70, %69 : vector<8x32xf32>
    %72 = arith.divf %70, %71 : vector<8x32xf32>
    %73 = vector.extract_strided_slice %51 {offsets = [0, 64], sizes = [8, 32], strides = [1, 1]} : vector<8x96xf32> to vector<8x32xf32>
    %74 = vector.extract_strided_slice %56 {offsets = [0, 64], sizes = [8, 32], strides = [1, 1]} : vector<8x96xf32> to vector<8x32xf32>
    %75 = arith.mulf %64, %74 : vector<8x32xf32>
    %76 = arith.addf %73, %75 : vector<8x32xf32>
    %77 = math.tanh %76 : vector<8x32xf32>
    %cst_32 = arith.constant 1.000000e+00 : f32
    %78 = vector.broadcast %cst_32 : f32 to vector<8x32xf32>
    %79 = arith.subf %78, %72 : vector<8x32xf32>
    %80 = arith.mulf %79, %77 : vector<8x32xf32>
    %81 = arith.mulf %72, %2 : vector<8x32xf32>
    %82 = arith.addf %80, %81 : vector<8x32xf32>
    %c0_33 = arith.constant 0 : index
    %c0_34 = arith.constant 0 : index
    %83 = vector.load %arg6[%c0_33, %c0_34] : memref<8x32xf32, #tpu.memory_space<vmem>>, vector<8x32xf32>
    tpu.vector_store %arg6[%c0_33, %c0_34], %82 {strides = array<i32>} : memref<8x32xf32, #tpu.memory_space<vmem>>, vector<8x32xf32>,
    return
  }
}

</mosaic_0001>

<bundles_post_ra>
// kernel: tpu_custom_call.1
= control target key start
LH: loop header
LB: loop body
LE: loop exit
PB: predicated region body
PF: predicated region fallthrough
CT: control target
= control target key end

     0   :  { %v926_v3 = vmov 0.0|0.0   ;;  %vm927_vm0 = vmmov 0   ;;  %v928_v6 = vmov 0.0   ;;  %s1114_s0 = inlined_call_operand.vmem [shape: f32[8,64], index: 0, kind: input, shape index: {}]   ;;  %s1115_s1 = inlined_call_operand.vmem [shape: f32[16,16], index: 1, kind: input, shape index: {}]   ;;  %s1116_s2 = inlined_call_operand.vmem [shape: f32[16,8], index: 2, kind: input, shape index: {}]   ;;  %s1117_s3 = inlined_call_operand.vmem [shape: bf16[8,16], index: 3, kind: input, shape index: {}]   ;;  %s1118_s4 = inlined_call_operand.vmem [shape: f32[96,16], index: 4, kind: input, shape index: {}]   ;;  %s1119_s5 = inlined_call_operand.vmem [shape: f32[96,96], index: 5, kind: input, shape index: {}]   ;;  %s1120_s6 = inlined_call_operand.hbm [shape: f32[8,32], index: 6, kind: output, shape index: {}]  }
   0x1   :  { %v26_v0 = vld [vmem:[%s1118_s4] sm:$0xff]  ;;  %v27_v1 = vld [vmem:[%s1118_s4 + $0x8] sm:$0xff]  ;;  %v28_v2 = vld [vmem:[%s1118_s4 + $0x10] sm:$0xff]  ;;  %855 = vmatprep.subr.bf16.mxu0 %v926_v3  ;;  %798 = vmatprep.mubr.msk.f32.mxu0 %vm927_vm0, %v928_v6 }
   0x2   :  { %v856_v4 = vpack.c.bf16 %v27_v1, %v26_v0  ;;  %v29_v5 = vld [vmem:[%s1118_s4 + $0x18] sm:$0xff] }
   0x3   :  { %v859_v7 = vpack.c.bf16 %v29_v5, %v28_v2 }
   0x4   :  { %857 = vmatpush3.bf16.msra.mxu0 %v856_v4 }
   0x5   :  { %11 = vsyncpa [#allocation3], 0  ;;  %858 = vmatprep.subr.bf16.mxu0 %v926_v3  ;;  %v30_v8 = vld [vmem:[%s1118_s4 + $0x20] sm:$0xff]  ;;  %v31_v9 = vld [vmem:[%s1118_s4 + $0x28] sm:$0xff]  ;;  %vm39_vm1 = vcmask 523264   ;;  %vm117_vm2 = vcmask 64512   ;;  %v202_v21 = vlaneseq }
   0x6   :  { %v862_v10 = vpack.c.bf16 %v31_v9, %v30_v8  ;;  %v32_v11 = vld [vmem:[%s1118_s4 + $0x30] sm:$0xff]  ;;  %v33_v12 = vld [vmem:[%s1118_s4 + $0x38] sm:$0xff]  ;;  %v1001_v14 = vld [vmem:[%s1114_s0] sm:$0xff]  ;;  %v929_v27 = vmov 1.0|1.0   ;;  %vm215_vm6 = vcmask 130048  }
   0x7   :  { %v865_v13 = vpack.c.bf16 %v33_v12, %v32_v11  ;;  %v113_v15 = vld [vmem:[%s1116_s2] sm:$0xff]  ;;  %v725_v16 = vld [vmem:[%s1118_s4 + $0x50] ss:$0 sm:$0xff]  ;;  %v114_v20 = vld [vmem:[%s1116_s2 + $0x8] sm:$0xff]  ;;  %v203_v22 = vshrl.u32 %v202_v21, 7  ;;  %v206_v24 = vand.u32 127, %v202_v21 }
   0x8   :  { %860 = vmatpush3.bf16.msra.mxu0 %v859_v7  ;;  %803 = vmatprep.mubr.msk.f32.mxu1 %vm117_vm2, %v113_v15  ;;  %v116_v28 = vld [vmem:[%s1115_s1 + $0x8] sm:$0xff]  ;;  %v115_v29 = vld [vmem:[%s1115_s1] sm:$0xff]  ;;  %s930_s28 = smov 96   ;;  %v441_v61 = vld [vmem:[%s1119_s5 + $0x10] sm:$0xff]  ;;  %vm518_vm12 = vcmask 261120   ;;  %s931_s24 = smov 64  }
   0x9   :  { %861 = vmatprep.subr.bf16.mxu0 %v926_v3  ;;  %v204_v23 = vadd.s32 8, %v203_v22  ;;  %v207_v25 = vxor.u32 1, %v203_v22  ;;  %v297_v36 = vand.u32 1, %v206_v24  ;;  %v359_v45 = vld [vmem:[%s1118_s4 + $0x40] sm:$0xff]  ;;  %v360_v46 = vld [vmem:[%s1118_s4 + $0x48] sm:$0xff]  ;;  %606 = vrot.lane.b32.xlu0 %v1001_v14, %s930_s28  ;;  %v442_v62 = vld [vmem:[%s1119_s5 + $0x18] sm:$0xff] }
   0xa   :  { %v313_v48 = vld [vmem:[%s1117_s3] sm:$0xf]  ;;  %v872_v49 = vpack.c.bf16 %v360_v46, %v359_v45  ;;  %v444_v51 = vld [vmem:[%s1119_s5 + $0x28] sm:$0xff]  ;;  %v881_v63 = vpack.c.bf16 %v442_v62, %v441_v61  ;;  %v597_v0 = vld [vmem:[%s1119_s5 + $0x30] sm:$0xff] }
   0xb   :  { %v208_v26 = vxor.u32 1, %v204_v23  ;;  %vm209_vm3 = vcmp.eq.s32.totalorder %v207_v25, %v206_v24  ;;  %vm298_vm7 = vcmp.eq.s32.totalorder %v297_v36, 0  ;;  %v443_v50 = vld [vmem:[%s1119_s5 + $0x20] sm:$0xff]  ;;  %v440_v54 = vld [vmem:[%s1119_s5 + $0x8] sm:$0xff]  ;;  %v598_v1 = vld [vmem:[%s1119_s5 + $0x38] sm:$0xff] }
   0xc   :  { %863 = vmatpush3.bf16.msra.mxu0 %v862_v10  ;;  %v875_v52 = vpack.c.bf16 %v444_v51, %v443_v50  ;;  %v439_v53 = vld [vmem:[%s1119_s5] sm:$0xff]  ;;  %v740_v2 = vld [vmem:[%s1118_s4 + $0x58] ss:$0 sm:$0xff]  ;;  %v884_v5 = vpack.c.bf16 %v598_v1, %v597_v0  ;;  %v600_v10 = vld [vmem:[%s1119_s5 + $0x48] sm:$0xff] }
   0xd   :  { %864 = vmatprep.subr.bf16.mxu0 %v926_v3  ;;  %vm210_vm4 = vcmp.eq.s32.totalorder %v208_v26, %v206_v24  ;;  %v878_v56 = vpack.c.bf16 %v440_v54, %v439_v53  ;;  %v599_v9 = vld [vmem:[%s1119_s5 + $0x40] sm:$0xff] }
   0xe   :  { %vm867_vm5 = vmpackc.low %vm210_vm4, %vm209_vm3  ;;  %v887_v11 = vpack.c.bf16 %v600_v10, %v599_v9 }
  0x10   :  { %866 = vmatpush3.bf16.msra.mxu0 %v865_v13 }
  0x11   :  { %874 = vmatprep.subr.bf16.mxu0 %v926_v3 }
  0x13   :  { %799 = vmatmul.mubr.msk.f32.vlgmr.msra.gmra.mrb[0].mxu0 %vm39_vm1, %v1001_v14 }
  0x14   :  { %830 = vmatprep.mubr.msk.f32.mxu0 %vm927_vm0, %v928_v6  ;;  %876 = vmatpush3.bf16.msra.mxu0 %v875_v52 }
  0x15   :  { %883 = vmatprep.subr.bf16.mxu0 %v926_v3 }
  0x7b   :  { %v607_v12 = vpop.permute.xlu0 %606 }
  0xe6   :  { %v109_v17 = vpop.f32.mrb[0].mxu0 }
  0xe7   :  { %v110_v18 = vadd.f32 %v725_v16, %v109_v17  ;;  %v800_v19 = vpop.f32.mrb[1].mxu0 }
  0xe8   :  { %v745_v19 = vld [vmem:[%s1119_s5 + $0x58] ss:$0 sm:$0xff] }
  0xe9   :  { %801 = vmatprep.subr.mxu1 %v110_v18 }
  0xea   :  { %802 = vmatpush3.msra.mxu1 %v110_v18 }
  0xeb   :  { %804 = vmatmul.mubr.msk.f32.vlgmr.msra.gmra.mrb[0].mxu1 %vm117_vm2, %v114_v20  ;;  %868 = vmatprep.subr.msk.bf16.mxu1 %vm867_vm5, %v929_v27 }
  0xec   :  { %870 = vmatpush3.bf16.msk.msra.mxu1 %vm867_vm5, %v929_v27 }
  0xed   :  { %813 = vmatprep.subr.bf16.mxu1 %v928_v6 }
 0x1be   :  { %v805_v30 = vpop.f32.mrb[0].mxu1 }
 0x1bf   :  { %v196_v31 = vadd.f32 %v805_v30, %v116_v28  ;;  %v190_v32 = vpop.f32.mrb[1].mxu1 }
 0x1c0   :  { %v191_v33 = vadd.f32 %v190_v32, %v115_v29 }
 0x1c1   :  { %v201_v35 = vmul.f32 2.0, %v196_v31 }
 0x1c2   :  { %v200_v34 = vmul.f32 2.0, %v191_v33 }
 0x1c4   :  { %810 = vmatprep.mubr.msk.f32.mxu1 %vm215_vm6, %v200_v34 }
 0x1c5   :  { %811 = vmatmul.mubr.msk.f32.vlgmr.msra.gmra.mrb[2].mxu1 %vm215_vm6, %v201_v35 }
 0x1c6   :  { %815 = vmatprep.mubr.msk.bf16.mxu1 %vm927_vm0, %v928_v6 }
 0x298   :  { %v812_v37 = vpop.f32.mrb[2].mxu1 }
 0x299   :  { %vm300_vm8 = vcmp.ge.f32.partialorder %v201_v35, %v812_v37  ;;  %vm306_vm9 = vcmp.gt.f32.partialorder %v201_v35, %v812_v37  ;;  %v288_v38 = vpop.f32.mrb[3].mxu1 }
 0x29a   :  { %v736_v39 = vsel %vm300_vm8, 1.0, %v928_v6  ;;  %v738_v40 = vsel %vm306_vm9, 1.0, %v928_v6  ;;  %vm299_vm10 = vcmp.ge.f32.partialorder %v200_v34, %v288_v38  ;;  %vm305_vm11 = vcmp.gt.f32.partialorder %v200_v34, %v288_v38 }
 0x29b   :  { %v312_v41 = vsel %vm298_vm7, %v736_v39, %v738_v40  ;;  %v735_v42 = vsel %vm299_vm10, 1.0, %v928_v6  ;;  %v737_v43 = vsel %vm305_vm11, 1.0, %v928_v6 }
 0x29c   :  { %v311_v44 = vsel %vm298_vm7, %v735_v42, %v737_v43 }
 0x29d   :  { %v314_v47 = vpack.c.bf16 %v312_v41, %v311_v44 }
 0x29f   :  { %814 = vmatpush3.bf16.msra.mxu1 %v314_v47 }
 0x2a0   :  { %871 = vmatprep.subr.bf16.mxu1 %v926_v3 }
 0x2a2   :  { %816 = vmatmul.mubr.msk.bf16.vlgmr.msra.gmra.mrb[4].mxu1 %vm215_vm6, %v313_v48 }
 0x2a3   :  { %873 = vmatpush3.bf16.msra.mxu1 %v872_v49  ;;  %823 = vmatprep.mubr.msk.f32.mxu1 %vm927_vm0, %v928_v6 }
 0x2a4   :  { %877 = vmatprep.subr.bf16.mxu1 %v926_v3 }
 0x375   :  { %v352_v55 = vpop.f32.mrb[4].mxu1 }
 0x376   :  { %v358_v57 = vmin.f32 %v352_v55, 1.0  ;;  %v817_v58 = vpop.f32.mrb[5].mxu1 }
 0x377   :  { %v355_v59 = vpop.f32.mrb[6].mxu1 }
 0x378   :  { %v818_v60 = vpop.f32.mrb[7].mxu1  ;;  %824 = vmatmul.mubr.msk.f32.vlgmr.msra.gmra.mrb[8].mxu1 %vm215_vm6, %v358_v57 }
 0x379   :  { %879 = vmatpush3.bf16.msra.mxu1 %v878_v56  ;;  %841 = vmatprep.mubr.msk.f32.mxu1 %vm927_vm0, %v928_v6 }
 0x37a   :  { %880 = vmatprep.subr.bf16.mxu1 %v926_v3 }
 0x37d   :  { %882 = vmatpush3.bf16.msra.mxu1 %v881_v63 }
 0x380   :  { %842 = vmatmul.mubr.msk.f32.vlgmr.msra.gmra.mrb[10].mxu1 %vm518_vm12, %v1001_v14 }
 0x44b   :  { %v435_v4 = vpop.f32.mrb[8].mxu1 }
 0x44c   :  { %v436_v7 = vadd.f32 %v740_v2, %v435_v4  ;;  %v825_v8 = vpop.f32.mrb[9].mxu1 }
 0x44e   :  { %831 = vmatmul.mubr.msk.f32.vlgmr.msra.gmra.mrb[2].mxu0 %vm215_vm6, %v436_v7 }
 0x44f   :  { %885 = vmatpush3.bf16.msra.mxu0 %v884_v5  ;;  %852 = vmatprep.mubr.msk.f32.mxu0 %vm927_vm0, %v928_v6 }
 0x450   :  { %886 = vmatprep.subr.bf16.mxu0 %v926_v3  ;;  %v744_v3 = vld [vmem:[%s1119_s5 + $0x50] ss:$0 sm:$0xff]  ;;  %s932_s5 = smov [#allocation2]  }
 0x451   :  { %s717_s27 = sshll.u32 %s932_s5, 4  ;;  %s718_s27 = int_to_ptr.vmem [resolvable:$true] %s717_s27 }
 0x452   :  { %s902_s29 = scalar_lea.vmem %s718_s27, 128  ;;  %p907_p1 = scmp.lt.s32.totalorder %s718_s27, %s718_s27 }
 0x453   :  { %888 = vmatpush3.bf16.msra.mxu0 %v887_v11  ;;  %v587_v13 = vpop.f32.mrb[10].mxu1  ;;  %p903_p0 = scmp.ne.s32.totalorder %s718_s27, %s902_s29  ;;  %p908_p2 = scmp.lt.s32.totalorder %s902_s29, %s902_s29 }
 0x454   :  { %v843_v15 = vpop.f32.mrb[11].mxu1 }
 0x455   :  { %p909_p3 = por %p908_p2, %p907_p1 }
 0x456   :  { %853 = vmatmul.mubr.msk.f32.vlgmr.msra.gmra.mrb[4].mxu0 %vm518_vm12, %v607_v12 }
 0x457   :  { %p910_p4 = pnand %p909_p3, %p903_p0 }
 0x521   :  { %v514_v16 = vpop.f32.mrb[2].mxu0 }
 0x522   :  { %v832_v17 = vpop.f32.mrb[3].mxu0  ;;  %v588_v18 = vadd.f32 %v587_v13, %v514_v16 }
 0x524   :  { %v596_v6 = vadd.f32 %v744_v3, %v588_v18 }
 0x529   :  { %v676_v20 = vpop.f32.mrb[4].mxu0 }
 0x52a   :  { %v677_v21 = vadd.f32 %v745_v19, %v676_v20  ;;  %v854_v22 = vpop.f32.mrb[5].mxu0 }
 0x52c   :  { %688 = vrot.lane.b32.xlu0 %v677_v21, %s931_s24  ;;  %v680_v23 = vadd.f32 %v677_v21, %v596_v6 }
 0x52e   :  { %v747_v24 = vmul.f32 -1.442695, %v680_v23 }
 0x530   :  { %896 = vpow2.f32 %v747_v24 }
 0x53a   :  { %v897_v25 = vpop.eup %896 }
 0x53b   :  { %v684_v26 = vadd.f32 1.0, %v897_v25 }
 0x53d   :  { %898 = vrcp.f32 %v684_v26 }
 0x547   :  { %v899_v27 = vpop.eup %898 }
 0x548   :  { %v698_v33 = vsub.f32 1.0, %v899_v27  ;;  %v704_v35 = vmul.f32 %v899_v27, %v1001_v14 }
 0x59e   :  { %v689_v28 = vpop.permute.xlu0 %688 }
 0x59f   :  { %v691_v29 = vmul.f32 %v899_v27, %v689_v28 }
 0x5a1   :  { %693 = vrot.lane.b32.xlu1 %v691_v29, %s931_s24 }
 0x613   :  { %v694_v30 = vpop.permute.xlu1 %693 }
 0x614   :  { %v696_v31 = vadd.f32 %v694_v30, %v596_v6 }
 0x616   :  { %900 = vtanh.f32 %v696_v31 }
 0x620   :  { %v901_v32 = vpop.eup %900 }
 0x621   :  { %700 = vrot.lane.b32.xlu1 %v901_v32, %s930_s28 }
 0x693   :  { %v701_v34 = vpop.permute.xlu1 %700 }
 0x694   :  { %v703_v36 = vmul.f32 %v701_v34, %v698_v33 }
 0x696   :  { %v705_v37 = vadd.f32 %v704_v35, %v703_v36 }
 0x698   :  { %707 = vrot.lane.b32.xlu0 %v705_v37, %s930_s28 }
 0x70a   :  { %v708_v38 = vpop.permute.xlu0 %707 }
 0x70b   :  { %710 = vst.msk [vmem:[#allocation2] sm:$0xff] %vm518_vm12, %v708_v38 }
 0x70c   :  { %913 = shalt.err (!%p910_p4)
}
 0x70d   :  { %s914_s7 = scalar_lea.hbm %s1120_s6, 128 }
 0x70e   :  { %p915_p5 = scmp.ne.s32.totalorder %s1120_s6, %s914_s7  ;;  %p918_p6 = scmp.lt.u32.totalorder %s914_s7, %s1120_s6 }
 0x710   :  { %p920_p7 = pnand %p918_p6, %p915_p5 }
 0x712   :  { %923 = shalt.err (!%p920_p7)
}
 0x713   :  { %720 = dma.vmem_to_hbm [thread:$0]  %s718_s27, 128, %s1120_s6, [#allocation3]  }
 0x714   :  { %924 = dma.done.wait [#allocation3], 128  }
 0x715   :  { %925 = vsyncadd [#allocation3], 4294967168 }
 0x716   :  { %724 = vsyncpa [#allocation3], 1 }

</bundles_post_ra>
